<compile_context>
chip_gen: v7x
topology: tpu7x:2x2x1
jax: 0.10.0
libtpu: 0.0.40
codegen_flags: <defaults>
</compile_context>

<pallas_src>
import functools

import jax
import jax.numpy as jnp
from jax.experimental import pallas as pl
from jax.experimental.pallas import tpu as pltpu

LANE = 128
DESIRED_BLOCK_ROWS = 2048   # (2048,128) f32 block = 1 MiB / stream / buffer
NUM_CORE_SPLITS = 2         # leading "parallel" grid axis (v7x megacore)


def _block_validity(logical_block, block_rows, n):
    """Boolean (block_rows, LANE) map of which elements of this block are real."""
    row_ids = jax.lax.broadcasted_iota(jnp.int32, (block_rows, LANE), 0)
    col_ids = jax.lax.broadcasted_iota(jnp.int32, (block_rows, LANE), 1)
    base = logical_block * (block_rows * LANE)
    return (base + row_ids * LANE + col_ids) < n


def _accumulate(sum_ref, cnt_ref, diff, cnt, block_rows):
    # (block_rows,128) -> (block_rows//8, 8, 128): each (8,128) slice is one
    # native f32 vreg tile, so summing axis 0 is pure elementwise VPU adds
    # (no cross-lane/XLU work per grid step).
    sum_ref[...] += diff.reshape(block_rows // 8, 8, LANE).sum(axis=0, keepdims=True)
    cnt_ref[...] += cnt.reshape(block_rows // 8, 8, LANE).sum(axis=0, keepdims=True)


def _mae_kernel(pred_ref, target_ref, sum_ref, cnt_ref, *, n, min_depth,
                block_rows, bpc):
    """mask=None path: validity computed in-kernel from target."""
    c = pl.program_id(0)
    j = pl.program_id(1)

    @pl.when(j == 0)
    def _():
        sum_ref[...] = jnp.zeros_like(sum_ref)
        cnt_ref[...] = jnp.zeros_like(cnt_ref)

    logical_block = c * bpc + j
    in_bounds = _block_validity(logical_block, block_rows, n)

    t = target_ref[...]
    p = pred_ref[...]
    valid = in_bounds & (t > min_depth)          # compare in native dtype (torch parity)
    diff = jnp.abs(p.astype(jnp.float32) - t.astype(jnp.float32))
    diff = jnp.where(valid, diff, 0.0)
    cnt = jnp.where(valid, 1.0, 0.0)
    _accumulate(sum_ref, cnt_ref, diff, cnt, block_rows)


def _mae_kernel_explicit_mask(pred_ref, target_ref, mask_ref, sum_ref, cnt_ref,
                              *, n, block_rows, bpc):
    """Explicit-mask path: mask streamed as int8 (1/4 the bytes of f32)."""
    c = pl.program_id(0)
    j = pl.program_id(1)

    @pl.when(j == 0)
    def _():
        sum_ref[...] = jnp.zeros_like(sum_ref)
        cnt_ref[...] = jnp.zeros_like(cnt_ref)

    logical_block = c * bpc + j
    in_bounds = _block_validity(logical_block, block_rows, n)

    t = target_ref[...]
    p = pred_ref[...]
    valid = in_bounds & (mask_ref[...] != 0)
    diff = jnp.abs(p.astype(jnp.float32) - t.astype(jnp.float32))
    diff = jnp.where(valid, diff, 0.0)
    cnt = jnp.where(valid, 1.0, 0.0)
    _accumulate(sum_ref, cnt_ref, diff, cnt, block_rows)


def _sublane_granularity(*dtypes):
    """Sublane multiple required so all streams' blocks tile natively."""
    g = 8
    for dt in dtypes:
        g = max(g, 32 // jnp.dtype(dt).itemsize)   # f32->8, bf16->16, i8->32
    return g


def _to_slab(x, rows):
    """Flatten x into a (rows, 128) lane-dense slab; pad only if needed."""
    flat = x.reshape(-1)
    pad = rows * LANE - flat.shape[0]
    if pad:  # rare: only when element count isn't granularity-aligned
        flat = jnp.pad(flat, (0, pad))
    return flat.reshape(rows, LANE)


@functools.partial(jax.jit, static_argnames=("interpolate", "min_depth"))
def mae_loss(pred, target, mask=None, interpolate=False, min_depth=0.001):
    """Masked MAE loss matching the PyTorch MAELoss.forward."""
    del interpolate  # unused, kept for API parity with the PyTorch module

    n = pred.size
    if mask is None:
        dtypes = (pred.dtype, target.dtype)
    else:
        mask = mask.astype(jnp.int8)
        dtypes = (pred.dtype, target.dtype, jnp.int8)

    g = _sublane_granularity(*dtypes)
    chunk = g * LANE
    rows = pl.cdiv(n, chunk) * g                 # 128-lane rows, multiple of g
    block_rows = min(DESIRED_BLOCK_ROWS, rows)   # both multiples of g
    total_blocks = pl.cdiv(rows, block_rows)
    bpc = pl.cdiv(total_blocks, NUM_CORE_SPLITS)  # blocks per core-split

    pred2d = _to_slab(pred, rows)
    target2d = _to_slab(target, rows)

    def in_map(c, j):
        # Clamp so a core-split with fewer real blocks re-reads a valid block;
        # its contribution is zeroed in-kernel via the flat-index validity test.
        return (jnp.minimum(c * bpc + j, total_blocks - 1), 0)

    def out_map(c, j):
        return (c, 0, 0)

    in_spec = pl.BlockSpec((block_rows, LANE), in_map)
    out_spec = pl.BlockSpec((1, 8, LANE), out_map)
    out_shape = (
        jax.ShapeDtypeStruct((NUM_CORE_SPLITS, 8, LANE), jnp.float32),
        jax.ShapeDtypeStruct((NUM_CORE_SPLITS, 8, LANE), jnp.float32),
    )

    if mask is None:
        kernel = functools.partial(_mae_kernel, n=n, min_depth=float(min_depth),
                                   block_rows=block_rows, bpc=bpc)
        operands = (pred2d, target2d)
        in_specs = [in_spec, in_spec]
    else:
        mask2d = _to_slab(mask, rows)
        kernel = functools.partial(_mae_kernel_explicit_mask, n=n,
                                   block_rows=block_rows, bpc=bpc)
        operands = (pred2d, target2d, mask2d)
        in_specs = [in_spec, in_spec, pl.BlockSpec((block_rows, LANE), in_map)]

    sum_parts, cnt_parts = pl.pallas_call(
        kernel,
        out_shape=out_shape,
        grid_spec=pltpu.PrefetchScalarGridSpec(
            num_scalar_prefetch=0,
            grid=(NUM_CORE_SPLITS, bpc),
            in_specs=in_specs,
            out_specs=[out_spec, out_spec],
        ),
        compiler_params=pltpu.CompilerParams(
            dimension_semantics=("parallel", "arbitrary")),
    )(*operands)

    total = jnp.sum(sum_parts)
    count = jnp.sum(cnt_parts)
    # 0/0 -> NaN matches torch.mean of an empty selection.
    return (total / count).astype(jnp.float32)


if __name__ == "__main__":
    key = jax.random.PRNGKey(0)
    k1, k2 = jax.random.split(key)

    # Small depth-map-like inputs, NCHW.
    B, C, H, W = 2, 4, 16, 16
    pred = jax.random.uniform(k1, (B, C, H, W), jnp.float32, minval=0.0, maxval=10.0)
    target = jax.random.uniform(k2, (B, C, H, W), jnp.float32, minval=-1.0, maxval=10.0)
    target = jnp.where(target < 0.0, 0.0, target)  # some invalid (<= min_depth) pixels

    # Path 1: implicit mask (target > min_depth) computed inside the kernel.
    out = jax.block_until_ready(mae_loss(pred, target))
    m = (target > 0.001).astype(jnp.float32)
    ref = jnp.sum(jnp.abs(pred - target) * m) / jnp.sum(m)
    assert jnp.allclose(out, ref, rtol=1e-5, atol=1e-5), (out, ref)

    # Path 2: explicit boolean mask, streamed as int8.
    emask = target > 1.5
    out2 = jax.block_until_ready(mae_loss(pred, target, mask=emask))
    m2 = emask.astype(jnp.float32)
    ref2 = jnp.sum(jnp.abs(pred - target) * m2) / jnp.sum(m2)
    assert jnp.allclose(out2, ref2, rtol=1e-5, atol=1e-5), (out2, ref2)

    print("KERNEL_OK")
</pallas_src>

<mosaic_0001>
module attributes {stable_mosaic.version = 11 : i64} {
  func.func @_mae_kernel(%arg0: i32, %arg1: i32, %arg2: memref<16x128xf32, #tpu.memory_space<vmem>>, %arg3: memref<16x128xf32, #tpu.memory_space<vmem>>, %arg4: memref<1x8x128xf32, #tpu.memory_space<vmem>>, %arg5: memref<1x8x128xf32, #tpu.memory_space<vmem>>) attributes {dimension_semantics = [#tpu.dimension_semantics<parallel>, #tpu.dimension_semantics<arbitrary>], iteration_bounds = array<i64: 2, 1>, scalar_prefetch = 0 : i64, scratch_operands = 0 : i64, tpu.core_type = #tpu.core_type<tc>, window_params = [{transform_indices = @transform_0, window_bounds = array<i64: 16, 128>}, {transform_indices = @transform_1, window_bounds = array<i64: 16, 128>}, {transform_indices = @transform_2, window_bounds = array<i64: 1, 8, 128>}, {transform_indices = @transform_3, window_bounds = array<i64: 1, 8, 128>}]} {
    %c0_i32 = arith.constant 0 : i32
    %0 = arith.cmpi eq, %arg1, %c0_i32 : i32
    %1 = arith.extui %0 : i1 to i32
    %c0_i32_0 = arith.constant 0 : i32
    %2 = arith.cmpi ne, %1, %c0_i32_0 : i32
    scf.if %2 {
      %cst_22 = arith.constant 0.000000e+00 : f32
      %39 = vector.broadcast %cst_22 : f32 to vector<1x8x128xf32>
      %c0_23 = arith.constant 0 : index
      %c0_24 = arith.constant 0 : index
      %c0_25 = arith.constant 0 : index
      %40 = vector.load %arg4[%c0_23, %c0_24, %c0_25] : memref<1x8x128xf32, #tpu.memory_space<vmem>>, vector<1x8x128xf32>
      tpu.vector_store %arg4[%c0_23, %c0_24, %c0_25], %39 {strides = array<i32>} : memref<1x8x128xf32, #tpu.memory_space<vmem>>, vector<1x8x128xf32>,
      %cst_26 = arith.constant 0.000000e+00 : f32
      %41 = vector.broadcast %cst_26 : f32 to vector<1x8x128xf32>
      %c0_27 = arith.constant 0 : index
      %c0_28 = arith.constant 0 : index
      %c0_29 = arith.constant 0 : index
      %42 = vector.load %arg5[%c0_27, %c0_28, %c0_29] : memref<1x8x128xf32, #tpu.memory_space<vmem>>, vector<1x8x128xf32>
      tpu.vector_store %arg5[%c0_27, %c0_28, %c0_29], %41 {strides = array<i32>} : memref<1x8x128xf32, #tpu.memory_space<vmem>>, vector<1x8x128xf32>,
    } else {
    }
    %c1_i32 = arith.constant 1 : i32
    %3 = arith.muli %arg0, %c1_i32 : i32
    %4 = arith.addi %3, %arg1 : i32
    %5 = tpu.iota {dimensions = array<i32: 0>} : vector<16x128xi32>
    %6 = tpu.iota {dimensions = array<i32: 1>} : vector<16x128xi32>
    %c2048_i32 = arith.constant 2048 : i32
    %7 = arith.muli %4, %c2048_i32 : i32
    %c128_i32 = arith.constant 128 : i32
    %8 = vector.broadcast %c128_i32 : i32 to vector<16x128xi32>
    %9 = arith.muli %5, %8 : vector<16x128xi32>
    %10 = vector.broadcast %7 : i32 to vector<16x128xi32>
    %11 = arith.addi %10, %9 : vector<16x128xi32>
    %12 = arith.addi %11, %6 : vector<16x128xi32>
    %c2048_i32_1 = arith.constant 2048 : i32
    %13 = vector.broadcast %c2048_i32_1 : i32 to vector<16x128xi32>
    %14 = arith.cmpi slt, %12, %13 : vector<16x128xi32>
    %c0 = arith.constant 0 : index
    %c0_2 = arith.constant 0 : index
    %15 = vector.load %arg3[%c0, %c0_2] : memref<16x128xf32, #tpu.memory_space<vmem>>, vector<16x128xf32>
    %c0_3 = arith.constant 0 : index
    %c0_4 = arith.constant 0 : index
    %16 = vector.load %arg2[%c0_3, %c0_4] : memref<16x128xf32, #tpu.memory_space<vmem>>, vector<16x128xf32>
    %cst = arith.constant 1.000000e-03 : f32
    %17 = vector.broadcast %cst : f32 to vector<16x128xf32>
    %18 = arith.cmpf ogt, %15, %17 : vector<16x128xf32>
    %19 = arith.andi %14, %18 : vector<16x128xi1>
    %20 = arith.subf %16, %15 : vector<16x128xf32>
    %21 = math.absf %20 : vector<16x128xf32>
    %cst_5 = arith.constant 0.000000e+00 : f32
    %22 = vector.broadcast %cst_5 : f32 to vector<16x128xf32>
    %23 = arith.select %19, %21, %22 : vector<16x128xi1>, vector<16x128xf32>
    %cst_6 = arith.constant 1.000000e+00 : f32
    %cst_7 = arith.constant 0.000000e+00 : f32
    %24 = vector.broadcast %cst_6 : f32 to vector<16x128xf32>
    %25 = vector.broadcast %cst_7 : f32 to vector<16x128xf32>
    %26 = arith.select %19, %24, %25 : vector<16x128xi1>, vector<16x128xf32>
    %c0_8 = arith.constant 0 : index
    %c0_9 = arith.constant 0 : index
    %c0_10 = arith.constant 0 : index
    %27 = vector.load %arg4[%c0_8, %c0_9, %c0_10] : memref<1x8x128xf32, #tpu.memory_space<vmem>>, vector<1x8x128xf32>
    %28 = vector.shape_cast %23 : vector<16x128xf32> to vector<2x8x128xf32>
    %cst_11 = arith.constant dense<0.000000e+00> : vector<8x128xf32>
    %29 = vector.multi_reduction <add>, %28, %cst_11 [0] : vector<2x8x128xf32> to vector<8x128xf32>
    %30 = vector.shape_cast %29 : vector<8x128xf32> to vector<1x8x128xf32>
    %31 = arith.addf %27, %30 : vector<1x8x128xf32>
    %c0_12 = arith.constant 0 : index
    %c0_13 = arith.constant 0 : index
    %c0_14 = arith.constant 0 : index
    %32 = vector.load %arg4[%c0_12, %c0_13, %c0_14] : memref<1x8x128xf32, #tpu.memory_space<vmem>>, vector<1x8x128xf32>
    tpu.vector_store %arg4[%c0_12, %c0_13, %c0_14], %31 {strides = array<i32>} : memref<1x8x128xf32, #tpu.memory_space<vmem>>, vector<1x8x128xf32>,
    %c0_15 = arith.constant 0 : index
    %c0_16 = arith.constant 0 : index
    %c0_17 = arith.constant 0 : index
    %33 = vector.load %arg5[%c0_15, %c0_16, %c0_17] : memref<1x8x128xf32, #tpu.memory_space<vmem>>, vector<1x8x128xf32>
    %34 = vector.shape_cast %26 : vector<16x128xf32> to vector<2x8x128xf32>
    %cst_18 = arith.constant dense<0.000000e+00> : vector<8x128xf32>
    %35 = vector.multi_reduction <add>, %34, %cst_18 [0] : vector<2x8x128xf32> to vector<8x128xf32>
    %36 = vector.shape_cast %35 : vector<8x128xf32> to vector<1x8x128xf32>
    %37 = arith.addf %33, %36 : vector<1x8x128xf32>
    %c0_19 = arith.constant 0 : index
    %c0_20 = arith.constant 0 : index
    %c0_21 = arith.constant 0 : index
    %38 = vector.load %arg5[%c0_19, %c0_20, %c0_21] : memref<1x8x128xf32, #tpu.memory_space<vmem>>, vector<1x8x128xf32>
    tpu.vector_store %arg5[%c0_19, %c0_20, %c0_21], %37 {strides = array<i32>} : memref<1x8x128xf32, #tpu.memory_space<vmem>>, vector<1x8x128xf32>,
    return
  }
  func.func @transform_0(%arg0: i32, %arg1: i32) -> (i32, i32) {
    %c1_i32 = arith.constant 1 : i32
    %0 = arith.muli %arg0, %c1_i32 : i32
    %1 = arith.addi %0, %arg1 : i32
    %c0_i32 = arith.constant 0 : i32
    %2 = arith.minsi %1, %c0_i32 : i32
    %c0_i32_0 = arith.constant 0 : i32
    %c0_i32_1 = arith.constant 0 : i32
    return %2, %c0_i32_0 : i32, i32
  }
  func.func @transform_1(%arg0: i32, %arg1: i32) -> (i32, i32) {
    %c1_i32 = arith.constant 1 : i32
    %0 = arith.muli %arg0, %c1_i32 : i32
    %1 = arith.addi %0, %arg1 : i32
    %c0_i32 = arith.constant 0 : i32
    %2 = arith.minsi %1, %c0_i32 : i32
    %c0_i32_0 = arith.constant 0 : i32
    %c0_i32_1 = arith.constant 0 : i32
    return %2, %c0_i32_0 : i32, i32
  }
  func.func @transform_2(%arg0: i32, %arg1: i32) -> (i32, i32, i32) {
    %c0_i32 = arith.constant 0 : i32
    %c0_i32_0 = arith.constant 0 : i32
    %c0_i32_1 = arith.constant 0 : i32
    return %arg0, %c0_i32, %c0_i32_0 : i32, i32, i32
  }
  func.func @transform_3(%arg0: i32, %arg1: i32) -> (i32, i32, i32) {
    %c0_i32 = arith.constant 0 : i32
    %c0_i32_0 = arith.constant 0 : i32
    %c0_i32_1 = arith.constant 0 : i32
    return %arg0, %c0_i32, %c0_i32_0 : i32, i32, i32
  }
}

</mosaic_0001>

<bundles_post_ra>
// kernel: mae_loss.1
= control target key start
LH: loop header
LB: loop body
LE: loop exit
PB: predicated region body
PF: predicated region fallthrough
CT: control target
= control target key end

     0   :  { %s492_s12 = smov 0   ;;  %s494_s13 = smov 0   ;;  %s534_s0 = inlined_call_operand.vmem [shape: f32[16,128], index: 0, kind: input, shape index: {}]   ;;  %s535_s1 = inlined_call_operand.vmem [shape: f32[16,128], index: 1, kind: input, shape index: {}]   ;;  %s536_s2 = inlined_call_operand.vmem [shape: f32[2,8,128], index: 2, kind: output, shape index: {0}]   ;;  %s537_s3 = inlined_call_operand.vmem [shape: f32[2,8,128], index: 3, kind: output, shape index: {1}]  }
   0x1   :  { %s496_s14 = smov 0  }
   0x2 LB: > { %s26_s15 = sadd.s32 1, %s465_s13  ;;  %p412_p0 = scmp.ge.s32.totalorder %s469_s14, 1  ;;  %s469_s14 = sphi %s496_s14, %s14_s14   ;;  %s465_s13 = sphi %s494_s13, %s539_s13   ;;  %s461_s12 = sphi %s492_s12, %s538_s12  }
   0x3   : > { %p28_p1 = scmp.ge.s32.totalorder %s26_s15, 2  ;;  %p188_p2 = scmp.lt.s32.totalorder %s469_s14, 3 }
   0x5   : > { %s541_s15 = smov (%p28_p1, %s26_s15), 0  ;;  %p189_p3 = pnand %p412_p0, %p188_p2 }
   0x6   : > { %p227_p4 = scmp.lt.s32.totalorder (!%p189_p3), %s461_s12, 0  ;;  %v265_v0 = vlaneseq (!%p189_p3)  ;;  %s419_s16 = sshll.u32 (!%p189_p3), %s461_s12, 11  ;;  %v471_v18 = vmov (!%p189_p3), 0.0  }
   0x7   : > { %192 = sbr.rel (%p189_p3) target bundleno = 32 (0x20), region = 28  ;;  %v273_v2 = vstv (!%p189_p3), %s419_s16  ;;  %p250_p5 = scmp.lt.s32.totalorder (!%p189_p3), %s461_s12, 1 }
   0x8   : > { %v266_v1 = vshrl.u32 (!%p189_p3), %v265_v0, 7  ;;  %v269_v4 = vand.u32 (!%p189_p3), 127, %v265_v0 }
   0xa   : > { %v267_v3 = vadd.s32 (!%p189_p3), 8, %v266_v1  ;;  %v271_v5 = vmul.u32 (!%p189_p3), 128, %v266_v1 }
   0xc   : > { %v272_v6 = vmul.u32 (!%p189_p3), 128, %v267_v3  ;;  %v274_v7 = vadd.s32 (!%p189_p3), %v273_v2, %v271_v5 }
   0xe   : > { %s228_s17 = scalar_select %p227_p4, %s461_s12, 0  ;;  %v275_v8 = vadd.s32 %v273_v2, %v272_v6  ;;  %v276_v9 = vadd.s32 %v274_v7, %v269_v4 }
   0xf   : > { %s545_s12 = smov (!%p250_p5, %s461_s12), 1 }
  0x10   : > { %s413_s18 = sshll.u32 %s228_s17, 1  ;;  %v277_v10 = vadd.s32 %v275_v8, %v269_v4  ;;  %vm278_vm0 = vcmp.lt.s32.totalorder %v276_v9, 2048  ;;  %s417_s26 = sshll.u32 %s545_s12, 3 }
  0x11   : > { %p230_p6 = scmp.lt.s32.totalorder %s413_s18, 1  ;;  %s257_s29 = scalar_lea.vmem %s537_s3, %s417_s26 }
  0x12   : > { %vm279_vm1 = vcmp.lt.s32.totalorder %v277_v10, 2048  ;;  %s253_s5 = scalar_lea.vmem %s536_s2, %s417_s26 }
  0x13   : > { %s543_s18 = smov (!%p230_p6, %s413_s18), 1 }
  0x14   : > { %s414_s19 = sshll.u32 %s543_s18, 3 }
  0x15   : > { %s233_s22 = scalar_lea.vmem %s534_s0, %s414_s19  ;;  %s245_s25 = scalar_lea.vmem %s535_s1, %s414_s19 }
  0x16   : > { %v280_v11 = vld [vmem:[%s245_s25] sm:$0xff]  ;;  %v281_v12 = vld [vmem:[%s245_s25 + $0x8] sm:$0xff] }
  0x17   : > { %v282_v13 = vld [vmem:[%s233_s22] sm:$0xff]  ;;  %v283_v14 = vld [vmem:[%s233_s22 + $0x8] sm:$0xff]  ;;  %vm284_vm2 = vcmp.gt.f32.partialorder %v280_v11, 0.001  ;;  %vm285_vm3 = vcmp.gt.f32.partialorder %v281_v12, 0.001 }
  0x18   : > { %v288_v15 = vsub.f32 %v282_v13, %v280_v11  ;;  %vm286_vm4 = vmand %vm278_vm0, %vm284_vm2  ;;  %v289_v16 = vsub.f32 %v283_v14, %v281_v12 }
  0x19   : > { %vm287_vm5 = vmand %vm279_vm1, %vm285_vm3  ;;  %v294_v19 = vsel %vm286_vm4, 1.0, %v471_v18 }
  0x1a   : > { %v290_v17 = vand.u32 2147483647, %v288_v15  ;;  %v291_v20 = vand.u32 2147483647, %v289_v16  ;;  %v295_v21 = vsel %vm287_vm5, 1.0, %v471_v18 }
  0x1b   : > { %v301_v23 = vadd.f32 %v295_v21, %v294_v19 }
  0x1c   : > { %v292_v22 = vsel %vm286_vm4, %v290_v17, 0.0  ;;  %v293_v24 = vsel %vm287_vm5, %v291_v20, 0.0 }
  0x1d   : > { %v297_v25 = vadd.f32 %v293_v24, %v292_v22  ;;  %303 = vst [vmem:[%s257_s29] sm:$0xff] %v301_v23 }
  0x1f   : > { %299 = vst [vmem:[%s253_s5] sm:$0xff] %v297_v25 }
  0x20 PF: > { %s14_s14 = sadd.s32 1, %s469_s14   ;;  %s538_s12 = smov %s465_s13 }
  0x21   : > { %p11_p7 = scmp.ge.s32.totalorder %s14_s14, 4   ;;  %s539_s13 = smov %s541_s15 }
  0x23   :  { %13 = sbr.rel (!%p11_p7) target bundleno = 2 (0x2), region = 77 }

</bundles_post_ra>
